<compile_context>
chip_gen: v5e
topology: v5e:2x2
jax: 0.10.0
libtpu: 0.0.40
codegen_flags: <defaults>
</compile_context>

<pallas_src>
import functools
import math

import jax
import jax.numpy as jnp
from jax.experimental import pallas as pl
from jax.experimental.pallas import tpu as pltpu

HIDDEN = 350        # logical hidden width (matches the PyTorch module)
HIDDEN_PAD = 384    # padded to 3 x 128 lanes; pad rows/cols are zero -> same math
TM_MAX = 512        # max batch-tile rows (working set stays ~1-2 MB even here)


def _round_up(x, m):
    return (x + m - 1) // m * m


def _actor_kernel(xe_ref, w1_ref, b1_ref, w2_ref, b2_ref, wh_ref, bh_ref,
                  out_ref, *, in_dim, out_dim):
    # xe = [state | eps] folded into one row-tiled input (single DMA per step).
    xe = xe_ref[...]                                   # (TM, in_dim+out_dim) f32
    eps = xe[:, in_dim:in_dim + out_dim]               # (TM, out_dim) f32

    # bf16 MXU operands, f32 accumulation; bias add / tanh / exp stay f32
    # (v5e has no bf16 VPU/EUP path).  w1 has zero rows under the eps lanes,
    # so xe @ w1 == state @ W1.
    h1 = jnp.tanh(jnp.dot(xe.astype(jnp.bfloat16), w1_ref[...],
                          preferred_element_type=jnp.float32) + b1_ref[...])
    h2 = jnp.tanh(jnp.dot(h1.astype(jnp.bfloat16), w2_ref[...],
                          preferred_element_type=jnp.float32) + b2_ref[...])
    # fused heads: one (HIDDEN_PAD, 2*out_dim) matmul -> [mu | log_std]; the
    # PyTorch module applies tanh to BOTH mu and log_std.
    head = jnp.tanh(jnp.dot(h2.astype(jnp.bfloat16), wh_ref[...],
                            preferred_element_type=jnp.float32) + bh_ref[...])
    mu = head[:, :out_dim]
    log_std = head[:, out_dim:2 * out_dim]
    std = jnp.exp(log_std)
    # reparameterized Normal(mu, std) sample with host-supplied eps ~ N(0, 1)
    action = mu + std * eps
    # Assemble the output in registers and store once.  Output is exactly
    # 3*out_dim lanes wide: no zero-fill, no masked sub-stores, no HBM write
    # amplification (previous 128-lane slab wrote ~10x more bytes than used).
    out_ref[...] = jnp.concatenate([action, mu, std], axis=1)


def init_actor_params(key, in_dim, out_dim):
    """PyTorch nn.Linear-style init: U(-1/sqrt(fan_in), 1/sqrt(fan_in)).

    Weights stored as (in_features, out_features) so y = x @ W + b.
    """
    def linear(k, fan_in, fan_out):
        kw, kb = jax.random.split(k)
        bound = 1.0 / math.sqrt(fan_in)
        w = jax.random.uniform(kw, (fan_in, fan_out), jnp.float32, -bound, bound)
        b = jax.random.uniform(kb, (1, fan_out), jnp.float32, -bound, bound)
        return w, b

    k1, k2, k3, k4 = jax.random.split(key, 4)
    w1, b1 = linear(k1, in_dim, HIDDEN)
    w2, b2 = linear(k2, HIDDEN, HIDDEN)
    w_mu, b_mu = linear(k3, HIDDEN, out_dim)
    w_ls, b_ls = linear(k4, HIDDEN, out_dim)
    return dict(w1=w1, b1=b1, w2=w2, b2=b2,
                w_mu=w_mu, b_mu=b_mu, w_ls=w_ls, b_ls=b_ls)


def pack_params(params):
    """One-time prep: pad HIDDEN 350->384 (zero pad), add zero rows to w1 for
    the folded-in eps lanes, fuse mu/log_std heads, cast weights to bf16
    (biases stay f32)."""
    in_dim = params["w1"].shape[0]
    out_dim = params["w_mu"].shape[1]
    h, hp = HIDDEN, HIDDEN_PAD

    # w1 takes the concatenated [state | eps] input; the eps rows are zero so
    # eps never leaks into the hidden layer.
    w1 = (jnp.zeros((in_dim + out_dim, hp), jnp.float32)
          .at[:in_dim, :h].set(params["w1"]))
    b1 = jnp.zeros((1, hp), jnp.float32).at[:, :h].set(params["b1"])
    w2 = jnp.zeros((hp, hp), jnp.float32).at[:h, :h].set(params["w2"])
    b2 = jnp.zeros((1, hp), jnp.float32).at[:, :h].set(params["b2"])
    wh = (jnp.zeros((hp, 2 * out_dim), jnp.float32)
          .at[:h, :out_dim].set(params["w_mu"])
          .at[:h, out_dim:].set(params["w_ls"]))
    bh = jnp.concatenate([params["b_mu"], params["b_ls"]], axis=1)

    return dict(w1=w1.astype(jnp.bfloat16), b1=b1,
                w2=w2.astype(jnp.bfloat16), b2=b2,
                wh=wh.astype(jnp.bfloat16), bh=bh)


def actor_forward(state, packed, eps):
    """Actor forward pass. Returns (action, (mu, std), mu, std)."""
    B, in_dim = state.shape
    out_dim = packed["bh"].shape[1] // 2
    hp = HIDDEN_PAD
    kin = in_dim + out_dim
    nout = 3 * out_dim

    # Fold eps into the state input: one row-tiled input DMA per grid step.
    xe = jnp.concatenate([state, eps], axis=1)          # (B, in_dim + out_dim)

    # Batch tiling: big tiles (up to TM_MAX rows) to amortize the ~0.35us/step
    # fixed cost, but >=2 tiles when B > 128 so ("parallel",) can shard the
    # grid across both v7x TensorCores.  TM only needs 8-row alignment (all
    # lane dims are full-array), which keeps batch padding waste small.
    if B <= 128:
        n_tiles = 1
    else:
        n_tiles = max(2, pl.cdiv(B, TM_MAX))
    TM = _round_up(pl.cdiv(B, n_tiles), 8)
    B_pad = n_tiles * TM
    if B_pad != B:
        xe = jnp.pad(xe, ((0, B_pad - B), (0, 0)))
    grid = (n_tiles,)

    fixed = lambda i: (0, 0)   # weight/bias blocks: same block every step (resident)
    rows = lambda i: (i, 0)    # activation/output blocks: tile over batch

    flops = 2 * B_pad * (kin * hp + hp * hp + hp * 2 * out_dim)
    transcendentals = B_pad * (2 * hp + 3 * out_dim)
    bytes_accessed = (2 * (kin * hp + hp * hp + hp * 2 * out_dim)   # bf16 weights
                      + 4 * (2 * hp + 2 * out_dim)                  # f32 biases
                      + 4 * B_pad * (kin + nout))                   # xe / out

    out = pl.pallas_call(
        functools.partial(_actor_kernel, in_dim=in_dim, out_dim=out_dim),
        out_shape=jax.ShapeDtypeStruct((B_pad, nout), jnp.float32),
        grid=grid,
        in_specs=[
            pl.BlockSpec((TM, kin), rows),           # [state | eps]
            pl.BlockSpec((kin, hp), fixed),          # w1 (bf16, eps rows zero)
            pl.BlockSpec((1, hp), fixed),            # b1
            pl.BlockSpec((hp, hp), fixed),           # w2 (bf16)
            pl.BlockSpec((1, hp), fixed),            # b2
            pl.BlockSpec((hp, 2 * out_dim), fixed),  # fused head W (bf16)
            pl.BlockSpec((1, 2 * out_dim), fixed),   # fused head b
        ],
        out_specs=pl.BlockSpec((TM, nout), rows),
        compiler_params=pltpu.CompilerParams(
            dimension_semantics=("parallel",)),      # shard batch tiles (v7x)
        cost_estimate=pl.CostEstimate(
            flops=flops, transcendentals=transcendentals,
            bytes_accessed=bytes_accessed),
    )(xe, packed["w1"], packed["b1"], packed["w2"], packed["b2"],
      packed["wh"], packed["bh"])

    action = out[:B, 0 * out_dim:1 * out_dim]
    mu = out[:B, 1 * out_dim:2 * out_dim]
    std = out[:B, 2 * out_dim:3 * out_dim]
    # TODO(synk): torch.distributions.Normal object has no Pallas equivalent;
    # the distribution is returned as its parameters (mu, std).
    return action, (mu, std), mu, std


if __name__ == "__main__":
    key = jax.random.PRNGKey(0)
    k_params, k_s1, k_e1, k_s2, k_e2, k_s3, k_e3 = jax.random.split(key, 7)

    in_dim, out_dim, batch = 24, 4, 8
    params = init_actor_params(k_params, in_dim, out_dim)
    packed = pack_params(params)

    def reference_f32(state, eps):
        h1 = jnp.tanh(state @ params["w1"] + params["b1"])
        h2 = jnp.tanh(h1 @ params["w2"] + params["b2"])
        mu = jnp.tanh(h2 @ params["w_mu"] + params["b_mu"])
        std = jnp.exp(jnp.tanh(h2 @ params["w_ls"] + params["b_ls"]))
        return mu + std * eps, mu, std

    def reference_bf16(state, eps):  # matches kernel's mixed precision
        d = lambda a, b: jnp.dot(a.astype(jnp.bfloat16), b.astype(jnp.bfloat16),
                                 preferred_element_type=jnp.float32)
        h1 = jnp.tanh(d(state, params["w1"]) + params["b1"])
        h2 = jnp.tanh(d(h1, params["w2"]) + params["b2"])
        mu = jnp.tanh(d(h2, params["w_mu"]) + params["b_mu"])
        std = jnp.exp(jnp.tanh(d(h2, params["w_ls"]) + params["b_ls"]))
        return mu + std * eps, mu, std

    def check(state, eps):
        action, _, mu, std = actor_forward(state, packed, eps)
        jax.block_until_ready((action, mu, std))
        assert action.shape == (state.shape[0], out_dim)
        a_b, mu_b, std_b = reference_bf16(state, eps)
        assert jnp.allclose(mu, mu_b, atol=5e-3)
        assert jnp.allclose(std, std_b, atol=5e-3)
        assert jnp.allclose(action, a_b, atol=2e-2)
        a_f, mu_f, std_f = reference_f32(state, eps)
        assert jnp.allclose(mu, mu_f, atol=1e-1)
        assert jnp.allclose(std, std_f, atol=1e-1)
        assert jnp.allclose(action, a_f, atol=2e-1)

    # small batch: single grid step, TM = 8
    check(jax.random.normal(k_s1, (batch, in_dim), jnp.float32),
          jax.random.normal(k_e1, (batch, out_dim), jnp.float32))

    # ragged mid batch: 2 tiles of 104 rows (+ padding), exercises megacore path
    check(jax.random.normal(k_s2, (200, in_dim), jnp.float32),
          jax.random.normal(k_e2, (200, out_dim), jnp.float32))

    # larger batch: 2 tiles of 304 rows, exercises the >128-row tile path
    check(jax.random.normal(k_s3, (600, in_dim), jnp.float32),
          jax.random.normal(k_e3, (600, out_dim), jnp.float32))

    print("KERNEL_OK")
</pallas_src>

<mosaic_0001>
module attributes {stable_mosaic.version = 11 : i64} {
  func.func @_actor_kernel(%arg0: i32, %arg1: memref<8x28xf32, #tpu.memory_space<vmem>>, %arg2: memref<28x384xbf16, #tpu.memory_space<vmem>>, %arg3: memref<1x384xf32, #tpu.memory_space<vmem>>, %arg4: memref<384x384xbf16, #tpu.memory_space<vmem>>, %arg5: memref<1x384xf32, #tpu.memory_space<vmem>>, %arg6: memref<384x8xbf16, #tpu.memory_space<vmem>>, %arg7: memref<1x8xf32, #tpu.memory_space<vmem>>, %arg8: memref<8x12xf32, #tpu.memory_space<vmem>>) attributes {dimension_semantics = [#tpu.dimension_semantics<parallel>], iteration_bounds = array<i64: 1>, scalar_prefetch = 0 : i64, scratch_operands = 0 : i64, tpu.core_type = #tpu.core_type<tc>, window_params = [{transform_indices = @transform_0, window_bounds = array<i64: 8, 28>}, {pipeline_mode = #tpu.pipeline_mode<synchronous>, transform_indices = @transform_1, window_bounds = array<i64: 28, 384>}, {pipeline_mode = #tpu.pipeline_mode<synchronous>, transform_indices = @transform_2, window_bounds = array<i64: 1, 384>}, {pipeline_mode = #tpu.pipeline_mode<synchronous>, transform_indices = @transform_3, window_bounds = array<i64: 384, 384>}, {pipeline_mode = #tpu.pipeline_mode<synchronous>, transform_indices = @transform_4, window_bounds = array<i64: 1, 384>}, {pipeline_mode = #tpu.pipeline_mode<synchronous>, transform_indices = @transform_5, window_bounds = array<i64: 384, 8>}, {pipeline_mode = #tpu.pipeline_mode<synchronous>, transform_indices = @transform_6, window_bounds = array<i64: 1, 8>}, {transform_indices = @transform_7, window_bounds = array<i64: 8, 12>}]} {
    %c0 = arith.constant 0 : index
    %c0_0 = arith.constant 0 : index
    %0 = vector.load %arg1[%c0, %c0_0] : memref<8x28xf32, #tpu.memory_space<vmem>>, vector<8x28xf32>
    %1 = vector.extract_strided_slice %0 {offsets = [0, 24], sizes = [8, 4], strides = [1, 1]} : vector<8x28xf32> to vector<8x4xf32>
    %2 = arith.truncf %0 : vector<8x28xf32> to vector<8x28xbf16>
    %c0_1 = arith.constant 0 : index
    %c0_2 = arith.constant 0 : index
    %3 = vector.load %arg2[%c0_1, %c0_2] : memref<28x384xbf16, #tpu.memory_space<vmem>>, vector<28x384xbf16>
    %cst = arith.constant dense<0.000000e+00> : vector<8x384xf32>
    %4 = tpu.matmul %2, %3, %cst {dimension_numbers = #tpu.dot_dimension_numbers<[1], [0], [0], [1], [0, 0, 1, 1], [], []>} : vector<8x28xbf16>, vector<28x384xbf16>, vector<8x384xf32> -> vector<8x384xf32>
    %c0_3 = arith.constant 0 : index
    %c0_4 = arith.constant 0 : index
    %5 = vector.load %arg3[%c0_3, %c0_4] : memref<1x384xf32, #tpu.memory_space<vmem>>, vector<1x384xf32>
    %6 = vector.broadcast %5 : vector<1x384xf32> to vector<8x384xf32>
    %7 = arith.addf %4, %6 : vector<8x384xf32>
    %8 = math.tanh %7 : vector<8x384xf32>
    %9 = arith.truncf %8 : vector<8x384xf32> to vector<8x384xbf16>
    %c0_5 = arith.constant 0 : index
    %c0_6 = arith.constant 0 : index
    %10 = vector.load %arg4[%c0_5, %c0_6] : memref<384x384xbf16, #tpu.memory_space<vmem>>, vector<384x384xbf16>
    %cst_7 = arith.constant dense<0.000000e+00> : vector<8x384xf32>
    %11 = tpu.matmul %9, %10, %cst_7 {dimension_numbers = #tpu.dot_dimension_numbers<[1], [0], [0], [1], [0, 0, 1, 1], [], []>} : vector<8x384xbf16>, vector<384x384xbf16>, vector<8x384xf32> -> vector<8x384xf32>
    %c0_8 = arith.constant 0 : index
    %c0_9 = arith.constant 0 : index
    %12 = vector.load %arg5[%c0_8, %c0_9] : memref<1x384xf32, #tpu.memory_space<vmem>>, vector<1x384xf32>
    %13 = vector.broadcast %12 : vector<1x384xf32> to vector<8x384xf32>
    %14 = arith.addf %11, %13 : vector<8x384xf32>
    %15 = math.tanh %14 : vector<8x384xf32>
    %16 = arith.truncf %15 : vector<8x384xf32> to vector<8x384xbf16>
    %c0_10 = arith.constant 0 : index
    %c0_11 = arith.constant 0 : index
    %17 = vector.load %arg6[%c0_10, %c0_11] : memref<384x8xbf16, #tpu.memory_space<vmem>>, vector<384x8xbf16>
    %cst_12 = arith.constant dense<0.000000e+00> : vector<8x8xf32>
    %18 = tpu.matmul %16, %17, %cst_12 {dimension_numbers = #tpu.dot_dimension_numbers<[1], [0], [0], [1], [0, 0, 1, 1], [], []>} : vector<8x384xbf16>, vector<384x8xbf16>, vector<8x8xf32> -> vector<8x8xf32>
    %c0_13 = arith.constant 0 : index
    %c0_14 = arith.constant 0 : index
    %19 = vector.load %arg7[%c0_13, %c0_14] : memref<1x8xf32, #tpu.memory_space<vmem>>, vector<1x8xf32>
    %20 = vector.broadcast %19 : vector<1x8xf32> to vector<8x8xf32>
    %21 = arith.addf %18, %20 : vector<8x8xf32>
    %22 = math.tanh %21 : vector<8x8xf32>
    %23 = vector.extract_strided_slice %22 {offsets = [0, 0], sizes = [8, 4], strides = [1, 1]} : vector<8x8xf32> to vector<8x4xf32>
    %24 = vector.extract_strided_slice %22 {offsets = [0, 4], sizes = [8, 4], strides = [1, 1]} : vector<8x8xf32> to vector<8x4xf32>
    %25 = math.exp %24 : vector<8x4xf32>
    %26 = arith.mulf %25, %1 : vector<8x4xf32>
    %27 = arith.addf %23, %26 : vector<8x4xf32>
    %28 = tpu.concatenate %27, %23, %25 in 1 : vector<8x4xf32>, vector<8x4xf32>, vector<8x4xf32> -> vector<8x12xf32>
    %c0_15 = arith.constant 0 : index
    %c0_16 = arith.constant 0 : index
    %29 = vector.load %arg8[%c0_15, %c0_16] : memref<8x12xf32, #tpu.memory_space<vmem>>, vector<8x12xf32>
    tpu.vector_store %arg8[%c0_15, %c0_16], %28 {strides = array<i32>} : memref<8x12xf32, #tpu.memory_space<vmem>>, vector<8x12xf32>,
    return
  }
  func.func @transform_0(%arg0: i32) -> (i32, i32) {
    %c0_i32 = arith.constant 0 : i32
    %c0_i32_0 = arith.constant 0 : i32
    return %arg0, %c0_i32 : i32, i32
  }
  func.func @transform_1(%arg0: i32) -> (i32, i32) {
    %c0_i32 = arith.constant 0 : i32
    %c0_i32_0 = arith.constant 0 : i32
    %c0_i32_1 = arith.constant 0 : i32
    return %c0_i32, %c0_i32_0 : i32, i32
  }
  func.func @transform_2(%arg0: i32) -> (i32, i32) {
    %c0_i32 = arith.constant 0 : i32
    %c0_i32_0 = arith.constant 0 : i32
    %c0_i32_1 = arith.constant 0 : i32
    return %c0_i32, %c0_i32_0 : i32, i32
  }
  func.func @transform_3(%arg0: i32) -> (i32, i32) {
    %c0_i32 = arith.constant 0 : i32
    %c0_i32_0 = arith.constant 0 : i32
    %c0_i32_1 = arith.constant 0 : i32
    return %c0_i32, %c0_i32_0 : i32, i32
  }
  func.func @transform_4(%arg0: i32) -> (i32, i32) {
    %c0_i32 = arith.constant 0 : i32
    %c0_i32_0 = arith.constant 0 : i32
    %c0_i32_1 = arith.constant 0 : i32
    return %c0_i32, %c0_i32_0 : i32, i32
  }
  func.func @transform_5(%arg0: i32) -> (i32, i32) {
    %c0_i32 = arith.constant 0 : i32
    %c0_i32_0 = arith.constant 0 : i32
    %c0_i32_1 = arith.constant 0 : i32
    return %c0_i32, %c0_i32_0 : i32, i32
  }
  func.func @transform_6(%arg0: i32) -> (i32, i32) {
    %c0_i32 = arith.constant 0 : i32
    %c0_i32_0 = arith.constant 0 : i32
    %c0_i32_1 = arith.constant 0 : i32
    return %c0_i32, %c0_i32_0 : i32, i32
  }
  func.func @transform_7(%arg0: i32) -> (i32, i32) {
    %c0_i32 = arith.constant 0 : i32
    %c0_i32_0 = arith.constant 0 : i32
    return %arg0, %c0_i32 : i32, i32
  }
}

</mosaic_0001>

<bundles_post_ra>
// kernel: tpu_custom_call.1
= control target key start
LH: loop header
LB: loop body
LE: loop exit
PB: predicated region body
PF: predicated region fallthrough
CT: control target
= control target key end

     0   :  { %12 = vsyncpa [#allocation3], 0  ;;  %s1813_s0 = inlined_call_operand.vmem [shape: f32[8,28], index: 0, kind: input, shape index: {}]   ;;  %s1814_s1 = inlined_call_operand.vmem [shape: bf16[28,384], index: 1, kind: input, shape index: {}]   ;;  %s1815_s2 = inlined_call_operand.vmem [shape: f32[1,384], index: 2, kind: input, shape index: {}]   ;;  %s1816_s3 = inlined_call_operand.hbm [shape: bf16[384,384], index: 3, kind: input, shape index: {}]   ;;  %s1817_s4 = inlined_call_operand.vmem [shape: f32[1,384], index: 4, kind: input, shape index: {}]   ;;  %s1818_s5 = inlined_call_operand.vmem [shape: bf16[384,8], index: 5, kind: input, shape index: {}]   ;;  %s1819_s6 = inlined_call_operand.vmem [shape: f32[1,8], index: 6, kind: input, shape index: {}]   ;;  %s1820_s7 = inlined_call_operand.hbm [shape: f32[8,12], index: 7, kind: output, shape index: {}]  }
   0x1   :  { %13 = vsyncpa [#allocation4], 0  ;;  %s24_s26 = sshll.u32 %s1816_s3, 4  ;;  %s1629_s27 = smov [#allocation2]   ;;  %s25_s26 = int_to_ptr.hbm [resolvable:$true] %s24_s26 }
   0x2   :  { %s26_s28 = sshll.u32 %s1629_s27, 4  ;;  %s1630_s29 = smov 192   ;;  %s27_s28 = int_to_ptr.vmem [resolvable:$true] %s26_s28 }
   0x3   :  { %s1631_s30 = smov 12  }
   0x4   :  { %32 = dma.hbm_to_vmem [thread:$0]  %s25_s26, 9216, %s27_s28, [#allocation3], %s1630_s29, %s1630_s29, %s1631_s30  }
   0x5   :  { %1625 = dma.done.wait [#allocation3], 9216  }
   0x6   :  { %1626 = vsyncadd [#allocation3], 4294958080  ;;  %vm95_vm0 = vcmask 1045504   ;;  %v1054_v0 = vld [vmem:[%s1814_s1 + $0x18] sm:$0xf]  ;;  %v1716_v15 = vld [vmem:[%s1813_s0] sm:$0xff] }
   0x7   :  { %v1455_v1 = vld [vmem:[%s1814_s1 + $0x20] sm:$0x30]  ;;  %v1454_v2 = vld [vmem:[%s1814_s1 + $0x1c] sm:$0xf]  ;;  %v1056_v4 = vld [vmem:[%s1814_s1 + $0x24] sm:$0x30]  ;;  %v45_v27 = vpack.c.bf16 %v1716_v15, %v1716_v15 }
   0x8   :  { %v1055_v3 = vor.u32 %v1455_v1, %v1054_v0  ;;  %v1062_v5 = vld [vmem:[%s1814_s1 + $0x20] sm:$0xf]  ;;  %v1456_v6 = vld [vmem:[%s1814_s1 + $0x28] sm:$0x30]  ;;  %v1059_v7 = vor.u32 %v1454_v2, %v1056_v4  ;;  %v1451_v11 = vld [vmem:[%s1814_s1 + $0x4] sm:$0xf] }
   0x9   :  { %v1063_v8 = vor.u32 %v1456_v6, %v1062_v5  ;;  %v1042_v9 = vld [vmem:[%s1814_s1] sm:$0xf]  ;;  %v1452_v10 = vld [vmem:[%s1814_s1 + $0x8] sm:$0xf0]  ;;  %v1044_v13 = vld [vmem:[%s1814_s1 + $0xc] sm:$0xf0] }
   0xa   :  { %v97_v12 = vsel %vm95_vm0, %v1055_v3, 0  ;;  %v1050_v14 = vld [vmem:[%s1814_s1 + $0x8] sm:$0xf]  ;;  %v100_v16 = vsel %vm95_vm0, %v1059_v7, 0  ;;  %v1043_v18 = vor.u32 %v1452_v10, %v1042_v9  ;;  %v1453_v19 = vld [vmem:[%s1814_s1 + $0x10] sm:$0xf0]  ;;  %v1047_v21 = vor.u32 %v1451_v11, %v1044_v13 }
   0xb   :  { %111 = vmatpush.bf16.msra.mxu0 %v97_v12  ;;  %v103_v17 = vsel %vm95_vm0, %v1063_v8, 0  ;;  %v1153_v20 = vld [vmem:[#allocation2 + $0xa8] sm:$0xf]  ;;  %124 = vmatpush.bf16.msra.mxu1 %v100_v16  ;;  %v1051_v22 = vor.u32 %v1453_v19, %v1050_v14  ;;  %v1479_v23 = vld [vmem:[#allocation2 + $0xb0] sm:$0xf0]  ;;  %vm91_vm1 = vcmask 228352  }
   0xc   :  { %137 = vmatpush.bf16.msra.mxu2 %v103_v17  ;;  %v1154_v24 = vor.u32 %v1479_v23, %v1153_v20  ;;  %v1141_v25 = vld [vmem:[#allocation2 + $0x90] sm:$0xf]  ;;  %v1476_v26 = vld [vmem:[#allocation2 + $0x98] sm:$0xf0]  ;;  %v1249_v28 = vld [vmem:[#allocation2 + $0x168] sm:$0xf] }
   0xd   :  { %v1503_v29 = vld [vmem:[#allocation2 + $0x170] sm:$0xf0]  ;;  %v1129_v30 = vld [vmem:[#allocation2 + $0x78] sm:$0xf]  ;;  %v1478_v32 = vld [vmem:[#allocation2 + $0xac] sm:$0xf]  ;;  %v1142_v34 = vor.u32 %v1476_v26, %v1141_v25 }
   0xe   :  { %638 = vmatpush.bf16.msra.mxu3 %v1154_v24  ;;  %v1250_v31 = vor.u32 %v1503_v29, %v1249_v28  ;;  %v1155_v33 = vld [vmem:[#allocation2 + $0xb4] sm:$0xf0]  ;;  %v1473_v35 = vld [vmem:[#allocation2 + $0x80] sm:$0xf0]  ;;  %v1237_v37 = vld [vmem:[#allocation2 + $0x150] sm:$0xf] }
   0xf   :  { %112 = vmatpush.bf16.msra.mxu0 %v1043_v18  ;;  %125 = vmatpush.bf16.msra.mxu1 %v1047_v21  ;;  %v1158_v36 = vor.u32 %v1478_v32, %v1155_v33  ;;  %v1500_v38 = vld [vmem:[#allocation2 + $0x158] sm:$0xf0]  ;;  %v1475_v40 = vld [vmem:[#allocation2 + $0x94] sm:$0xf]  ;;  %v1143_v41 = vld [vmem:[#allocation2 + $0x9c] sm:$0xf0]  ;;  %v1130_v49 = vor.u32 %v1473_v35, %v1129_v30 }
  0x10   :  { %138 = vmatpush.bf16.msra.mxu2 %v1051_v22  ;;  %v1238_v39 = vor.u32 %v1500_v38, %v1237_v37  ;;  %v1345_v42 = vld [vmem:[#allocation2 + $0x228] sm:$0xf]  ;;  %v1146_v43 = vor.u32 %v1475_v40, %v1143_v41  ;;  %v1527_v44 = vld [vmem:[#allocation2 + $0x230] sm:$0xf0]  ;;  %v1225_v46 = vld [vmem:[#allocation2 + $0x138] sm:$0xf] }
  0x11   :  { %v1346_v45 = vor.u32 %v1527_v44, %v1345_v42  ;;  %v1497_v47 = vld [vmem:[#allocation2 + $0x140] sm:$0xf0]  ;;  %v1472_v48 = vld [vmem:[#allocation2 + $0x7c] sm:$0xf]  ;;  %v1131_v50 = vld [vmem:[#allocation2 + $0x84] sm:$0xf0] }
  0x12   :  { %1064 = vmatmul.msk.bf16.vlgmr.msra.gmra.mxu0 %vm91_vm1, %v45_v27  ;;  %1065 = vmatmul.msk.bf16.vlgmr.msra.gmra.mxu1 %vm91_vm1, %v45_v27  ;;  %v1333_v51 = vld [vmem:[#allocation2 + $0x210] sm:$0xf]  ;;  %v1524_v52 = vld [vmem:[#allocation2 + $0x218] sm:$0xf0]  ;;  %v1117_v53 = vld [vmem:[#allocation2 + $0x60] sm:$0xf]  ;;  %v1226_v55 = vor.u32 %v1497_v47, %v1225_v46  ;;  %v1134_v57 = vor.u32 %v1472_v48, %v1131_v50 }
  0x13   :  { %651 = vmatpush.bf16.msrb.mxu0 %v1250_v31  ;;  %1066 = vmatmul.msk.bf16.vlgmr.msra.gmra.mxu2 %vm91_vm1, %v45_v27  ;;  %v1470_v54 = vld [vmem:[#allocation2 + $0x68] sm:$0xf0]  ;;  %v1334_v56 = vor.u32 %v1524_v52, %v1333_v51  ;;  %v1213_v58 = vld [vmem:[#allocation2 + $0x120] sm:$0xf]  ;;  %v1469_v60 = vld [vmem:[#allocation2 + $0x64] sm:$0xf] }
  0x14   :  { %677 = vmatpush.bf16.msrb.mxu2 %v1158_v36  ;;  %639 = vmatpush.bf16.msra.mxu3 %v1142_v34  ;;  %v1494_v59 = vld [vmem:[#allocation2 + $0x128] sm:$0xf0]  ;;  %v1119_v61 = vld [vmem:[#allocation2 + $0x6c] sm:$0xf0]  ;;  %v1321_v62 = vld [vmem:[#allocation2 + $0x1f8] sm:$0xf]  ;;  %v1118_v0 = vor.u32 %v1470_v54, %v1117_v53 }
  0x15   :  { %664 = vmatpush.bf16.msrb.mxu1 %v1346_v45  ;;  %v1521_v63 = vld [vmem:[#allocation2 + $0x200] sm:$0xf0]  ;;  %v1105_v1 = vld [vmem:[#allocation2 + $0x48] sm:$0xf]  ;;  %v1467_v2 = vld [vmem:[#allocation2 + $0x50] sm:$0xf0]  ;;  %v1214_v3 = vor.u32 %v1494_v59, %v1213_v58  ;;  %v1122_v6 = vor.u32 %v1469_v60, %v1119_v61 }
  0x16   :  { %v1322_v4 = vor.u32 %v1521_v63, %v1321_v62  ;;  %v1201_v5 = vld [vmem:[#allocation2 + $0x108] sm:$0xf]  ;;  %v1491_v7 = vld [vmem:[#allocation2 + $0x110] sm:$0xf0]  ;;  %v1309_v8 = vld [vmem:[#allocation2 + $0x1e0] sm:$0xf]  ;;  %v1106_v12 = vor.u32 %v1467_v2, %v1105_v1 }
  0x17   :  { %652 = vmatpush.bf16.msrb.mxu0 %v1238_v39  ;;  %v1518_v9 = vld [vmem:[#allocation2 + $0x1e8] sm:$0xf0]  ;;  %v1107_v11 = vld [vmem:[#allocation2 + $0x54] sm:$0xf0]  ;;  %v1093_v13 = vld [vmem:[#allocation2 + $0x30] sm:$0xf]  ;;  %v1202_v16 = vor.u32 %v1491_v7, %v1201_v5 }
  0x18   :  { %678 = vmatpush.bf16.msrb.mxu2 %v1146_v43  ;;  %640 = vmatpush.bf16.msra.mxu3 %v1130_v49  ;;  %v1466_v10 = vld [vmem:[#allocation2 + $0x4c] sm:$0xf]  ;;  %v1464_v14 = vld [vmem:[#allocation2 + $0x38] sm:$0xf0]  ;;  %v1310_v17 = vor.u32 %v1518_v9, %v1309_v8  ;;  %v1189_v18 = vld [vmem:[#allocation2 + $0xf0] sm:$0xf] }
  0x19   :  { %665 = vmatpush.bf16.msrb.mxu1 %v1334_v56  ;;  %v1110_v19 = vor.u32 %v1466_v10, %v1107_v11  ;;  %v1488_v20 = vld [vmem:[#allocation2 + $0xf8] sm:$0xf0]  ;;  %v1297_v21 = vld [vmem:[#allocation2 + $0x1c8] sm:$0xf]  ;;  %v1515_v22 = vld [vmem:[#allocation2 + $0x1d0] sm:$0xf0]  ;;  %v1094_v25 = vor.u32 %v1464_v14, %v1093_v13 }
  0x1a   :  { %v1463_v23 = vld [vmem:[#allocation2 + $0x34] sm:$0xf]  ;;  %v1095_v24 = vld [vmem:[#allocation2 + $0x3c] sm:$0xf0]  ;;  %v1081_v26 = vld [vmem:[#allocation2 + $0x18] sm:$0xf]  ;;  %v1190_v28 = vor.u32 %v1488_v20, %v1189_v18  ;;  %v1298_v29 = vor.u32 %v1515_v22, %v1297_v21 }
  0x1b   :  { %653 = vmatpush.bf16.msrb.mxu0 %v1226_v55  ;;  %v1461_v27 = vld [vmem:[#allocation2 + $0x20] sm:$0xf0]  ;;  %v1177_v30 = vld [vmem:[#allocation2 + $0xd8] sm:$0xf]  ;;  %v1098_v31 = vor.u32 %v1463_v23, %v1095_v24  ;;  %v1285_v33 = vld [vmem:[#allocation2 + $0x1b0] sm:$0xf] }
  0x1c   :  { %679 = vmatpush.bf16.msrb.mxu2 %v1134_v57  ;;  %641 = vmatpush.bf16.msra.mxu3 %v1118_v0  ;;  %v1485_v32 = vld [vmem:[#allocation2 + $0xe0] sm:$0xf0]  ;;  %v1512_v34 = vld [vmem:[#allocation2 + $0x1b8] sm:$0xf0]  ;;  %v1083_v36 = vld [vmem:[#allocation2 + $0x24] sm:$0xf0]  ;;  %v1082_v37 = vor.u32 %v1461_v27, %v1081_v26 }
  0x1d   :  { %666 = vmatpush.bf16.msrb.mxu1 %v1322_v4  ;;  %v1460_v35 = vld [vmem:[#allocation2 + $0x1c] sm:$0xf]  ;;  %v1069_v38 = vld [vmem:[#allocation2] sm:$0xf]  ;;  %v1458_v39 = vld [vmem:[#allocation2 + $0x8] sm:$0xf0]  ;;  %v1178_v42 = vor.u32 %v1485_v32, %v1177_v30  ;;  %v1286_v43 = vor.u32 %v1512_v34, %v1285_v33 }
  0x1e   :  { %v1502_v40 = vld [vmem:[#allocation2 + $0x16c] sm:$0xf]  ;;  %v1251_v41 = vld [vmem:[#allocation2 + $0x174] sm:$0xf0]  ;;  %v1165_v44 = vld [vmem:[#allocation2 + $0xc0] sm:$0xf]  ;;  %v1086_v45 = vor.u32 %v1460_v35, %v1083_v36  ;;  %v1070_v52 = vor.u32 %v1458_v39, %v1069_v38 }
  0x1f   :  { %654 = vmatpush.bf16.msrb.mxu0 %v1214_v3  ;;  %v1482_v46 = vld [vmem:[#allocation2 + $0xc8] sm:$0xf0]  ;;  %v1457_v47 = vld [vmem:[#allocation2 + $0x4] sm:$0xf]  ;;  %v1071_v48 = vld [vmem:[#allocation2 + $0xc] sm:$0xf0]  ;;  %v1254_v56 = vor.u32 %v1502_v40, %v1251_v41 }
  0x20   :  { %680 = vmatpush.bf16.msrb.mxu2 %v1122_v6  ;;  %642 = vmatpush.bf16.msra.mxu3 %v1106_v12  ;;  %v1526_v49 = vld [vmem:[#allocation2 + $0x22c] sm:$0xf]  ;;  %v1347_v50 = vld [vmem:[#allocation2 + $0x234] sm:$0xf0]  ;;  %v1257_v51 = vld [vmem:[#allocation2 + $0x170] sm:$0xf]  ;;  %v1166_v57 = vor.u32 %v1482_v46, %v1165_v44  ;;  %v1074_v60 = vor.u32 %v1457_v47, %v1071_v48 }
  0x21   :  { %667 = vmatpush.bf16.msrb.mxu1 %v1310_v17  ;;  %v1504_v53 = vld [vmem:[#allocation2 + $0x178] sm:$0xf0]  ;;  %v1273_v54 = vld [vmem:[#allocation2 + $0x198] sm:$0xf]  ;;  %v1509_v55 = vld [vmem:[#allocation2 + $0x1a0] sm:$0xf0]  ;;  %v1350_v61 = vor.u32 %v1526_v49, %v1347_v50 }
  0x22   :  { %v1499_v58 = vld [vmem:[#allocation2 + $0x154] sm:$0xf]  ;;  %v1239_v59 = vld [vmem:[#allocation2 + $0x15c] sm:$0xf0]  ;;  %v1258_v62 = vor.u32 %v1504_v53, %v1257_v51  ;;  %v1274_v63 = vor.u32 %v1509_v55, %v1273_v54  ;;  %v1496_v1 = vld [vmem:[#allocation2 + $0x13c] sm:$0xf] }
  0x23   :  { %655 = vmatpush.bf16.msrb.mxu0 %v1202_v16  ;;  %v1242_v0 = vor.u32 %v1499_v58, %v1239_v59  ;;  %v1227_v2 = vld [vmem:[#allocation2 + $0x144] sm:$0xf0]  ;;  %v1493_v4 = vld [vmem:[#allocation2 + $0x124] sm:$0xf]  ;;  %v1215_v5 = vld [vmem:[#allocation2 + $0x12c] sm:$0xf0] }
  0x24   :  { %681 = vmatpush.bf16.msrb.mxu2 %v1110_v19  ;;  %643 = vmatpush.bf16.msra.mxu3 %v1094_v25  ;;  %v1230_v3 = vor.u32 %v1496_v1, %v1227_v2  ;;  %v1218_v6 = vor.u32 %v1493_v4, %v1215_v5  ;;  %v1490_v7 = vld [vmem:[#allocation2 + $0x10c] sm:$0xf]  ;;  %v1203_v8 = vld [vmem:[#allocation2 + $0x114] sm:$0xf0]  ;;  %v1523_v10 = vld [vmem:[#allocation2 + $0x214] sm:$0xf] }
  0x25   :  { %668 = vmatpush.bf16.msrb.mxu1 %v1298_v29  ;;  %v1206_v9 = vor.u32 %v1490_v7, %v1203_v8  ;;  %v1335_v11 = vld [vmem:[#allocation2 + $0x21c] sm:$0xf0]  ;;  %v1245_v12 = vld [vmem:[#allocation2 + $0x158] sm:$0xf]  ;;  %v1501_v14 = vld [vmem:[#allocation2 + $0x160] sm:$0xf0] }
  0x26   :  { %v1338_v13 = vor.u32 %v1523_v10, %v1335_v11  ;;  %v1261_v16 = vld [vmem:[#allocation2 + $0x180] sm:$0xf]  ;;  %v1246_v17 = vor.u32 %v1501_v14, %v1245_v12  ;;  %v1506_v18 = vld [vmem:[#allocation2 + $0x188] sm:$0xf0]  ;;  %v1161_v19 = vld [vmem:[#allocation2 + $0xb0] sm:$0xf] }
  0x27   :  { %656 = vmatpush.bf16.msrb.mxu0 %v1190_v28  ;;  %v1480_v20 = vld [vmem:[#allocation2 + $0xb8] sm:$0xf0]  ;;  %v1262_v21 = vor.u32 %v1506_v18, %v1261_v16  ;;  %v1487_v23 = vld [vmem:[#allocation2 + $0xf4] sm:$0xf]  ;;  %v1191_v24 = vld [vmem:[#allocation2 + $0xfc] sm:$0xf0] }
  0x28   :  { %682 = vmatpush.bf16.msrb.mxu2 %v1098_v31  ;;  %644 = vmatpush.bf16.msra.mxu3 %v1082_v37  ;;  %v1162_v22 = vor.u32 %v1480_v20, %v1161_v19  ;;  %v1194_v25 = vor.u32 %v1487_v23, %v1191_v24  ;;  %v1520_v26 = vld [vmem:[#allocation2 + $0x1fc] sm:$0xf]  ;;  %v1323_v27 = vld [vmem:[#allocation2 + $0x204] sm:$0xf0]  ;;  %v1233_v28 = vld [vmem:[#allocation2 + $0x140] sm:$0xf] }
  0x29   :  { %669 = vmatpush.bf16.msrb.mxu1 %v1286_v43  ;;  %v1326_v29 = vor.u32 %v1520_v26, %v1323_v27  ;;  %v1498_v30 = vld [vmem:[#allocation2 + $0x148] sm:$0xf0]  ;;  %v1149_v32 = vld [vmem:[#allocation2 + $0x98] sm:$0xf]  ;;  %v1477_v33 = vld [vmem:[#allocation2 + $0xa0] sm:$0xf0] }
  0x2a   :  { %v1234_v31 = vor.u32 %v1498_v30, %v1233_v28  ;;  %v1150_v34 = vor.u32 %v1477_v33, %v1149_v32  ;;  %v1484_v35 = vld [vmem:[#allocation2 + $0xdc] sm:$0xf]  ;;  %v1179_v36 = vld [vmem:[#allocation2 + $0xe4] sm:$0xf0]  ;;  %v1517_v38 = vld [vmem:[#allocation2 + $0x1e4] sm:$0xf] }
  0x2b   :  { %657 = vmatpush.bf16.msrb.mxu0 %v1178_v42  ;;  %v1182_v37 = vor.u32 %v1484_v35, %v1179_v36  ;;  %v1311_v39 = vld [vmem:[#allocation2 + $0x1ec] sm:$0xf0]  ;;  %v1221_v40 = vld [vmem:[#allocation2 + $0x128] sm:$0xf]  ;;  %v1495_v42 = vld [vmem:[#allocation2 + $0x130] sm:$0xf0] }
  0x2c   :  { %683 = vmatpush.bf16.msrb.mxu2 %v1086_v45  ;;  %645 = vmatpush.bf16.msra.mxu3 %v1070_v52  ;;  %v1314_v41 = vor.u32 %v1517_v38, %v1311_v39  ;;  %v1222_v43 = vor.u32 %v1495_v42, %v1221_v40  ;;  %v1137_v44 = vld [vmem:[#allocation2 + $0x80] sm:$0xf]  ;;  %v1474_v45 = vld [vmem:[#allocation2 + $0x88] sm:$0xf0]  ;;  %v1481_v47 = vld [vmem:[#allocation2 + $0xc4] sm:$0xf] }
  0x2d   :  { %670 = vmatpush.bf16.msrb.mxu1 %v1274_v63  ;;  %v1138_v46 = vor.u32 %v1474_v45, %v1137_v44  ;;  %v1167_v48 = vld [vmem:[#allocation2 + $0xcc] sm:$0xf0]  ;;  %v1514_v50 = vld [vmem:[#allocation2 + $0x1cc] sm:$0xf]  ;;  %v1299_v51 = vld [vmem:[#allocation2 + $0x1d4] sm:$0xf0] }
  0x2e   :  { %v1170_v49 = vor.u32 %v1481_v47, %v1167_v48  ;;  %v1209_v52 = vld [vmem:[#allocation2 + $0x110] sm:$0xf]  ;;  %v1302_v53 = vor.u32 %v1514_v50, %v1299_v51  ;;  %v1492_v54 = vld [vmem:[#allocation2 + $0x118] sm:$0xf0]  ;;  %v1511_v59 = vld [vmem:[#allocation2 + $0x1b4] sm:$0xf] }
  0x2f   :  { %658 = vmatpush.bf16.msrb.mxu0 %v1166_v57  ;;  %v1210_v55 = vor.u32 %v1492_v54, %v1209_v52  ;;  %v1471_v57 = vld [vmem:[#allocation2 + $0x70] sm:$0xf0]  ;;  %v1489_v63 = vld [vmem:[#allocation2 + $0x100] sm:$0xf0]  ;;  %v1113_v1 = vld [vmem:[#allocation2 + $0x50] sm:$0xf] }
  0x30   :  { %690 = vmatpush.bf16.msrb.mxu3 %v1254_v56  ;;  %684 = vmatpush.bf16.msrb.mxu2 %v1074_v60  ;;  %v1125_v56 = vld [vmem:[#allocation2 + $0x68] sm:$0xf]  ;;  %v1287_v60 = vld [vmem:[#allocation2 + $0x1bc] sm:$0xf0]  ;;  %v1468_v2 = vld [vmem:[#allocation2 + $0x58] sm:$0xf0] }
  0x31   :  { %671 = vmatpush.bf16.msrb.mxu1 %v1262_v21  ;;  %v1126_v58 = vor.u32 %v1471_v57, %v1125_v56  ;;  %v1508_v4 = vld [vmem:[#allocation2 + $0x19c] sm:$0xf]  ;;  %v1275_v5 = vld [vmem:[#allocation2 + $0x1a4] sm:$0xf0]  ;;  %v1486_v8 = vld [vmem:[#allocation2 + $0xe8] sm:$0xf0] }
  0x32   :  { %v1278_v7 = vor.u32 %v1508_v4, %v1275_v5  ;;  %v1101_v10 = vld [vmem:[#allocation2 + $0x38] sm:$0xf]  ;;  %v1465_v11 = vld [vmem:[#allocation2 + $0x40] sm:$0xf0]  ;;  %v1263_v14 = vld [vmem:[#allocation2 + $0x18c] sm:$0xf0] }
  0x33   :  { %703 = vmatpush.bf16.msra.mxu0 %v1350_v61  ;;  %v1197_v61 = vld [vmem:[#allocation2 + $0xf8] sm:$0xf]  ;;  %v1505_v12 = vld [vmem:[#allocation2 + $0x184] sm:$0xf]  ;;  %v1173_v16 = vld [vmem:[#allocation2 + $0xc8] sm:$0xf] }
  0x34   :  { %729 = vmatpush.bf16.msra.mxu2 %v1258_v62  ;;  %691 = vmatpush.bf16.msrb.mxu3 %v1242_v0  ;;  %v1290_v62 = vor.u32 %v1511_v59, %v1287_v60  ;;  %v1198_v0 = vor.u32 %v1489_v63, %v1197_v61  ;;  %v1266_v18 = vor.u32 %v1505_v12, %v1263_v14  ;;  %v1089_v20 = vld [vmem:[#allocation2 + $0x20] sm:$0xf]  ;;  %v1462_v21 = vld [vmem:[#allocation2 + $0x28] sm:$0xf0]  ;;  %v1459_v26 = vld [vmem:[#allocation2 + $0x10] sm:$0xf0] }
  0x35   :  { %716 = vmatpush.bf16.msra.mxu1 %v1162_v22  ;;  %v54_v22 = vld [vmem:[%s1815_s2] sm:$0x7]  ;;  %v1090_v23 = vor.u32 %v1462_v21, %v1089_v20  ;;  %v1528_v35 = vld [vmem:[#allocation2 + $0x238] sm:$0xf0]  ;;  %v1341_v44 = vld [vmem:[#allocation2 + $0x218] sm:$0xf] }
  0x36   :  { %v56_v24 = vperm.slane %v54_v22, 0  ;;  %v57_v27 = vperm.slane %v54_v22, 1  ;;  %v58_v33 = vperm.slane %v54_v22, 2  ;;  %v1525_v45 = vld [vmem:[#allocation2 + $0x220] sm:$0xf0]  ;;  %v1536_v47 = vld [vmem:[%s1818_s5 + $0x38] sm:$0xff] }
  0x37   :  { %704 = vmatpush.bf16.msra.mxu0 %v1338_v13  ;;  %v1102_v13 = vor.u32 %v1465_v11, %v1101_v10  ;;  %v1342_v48 = vor.u32 %v1525_v45, %v1341_v44  ;;  %v1522_v50 = vld [vmem:[#allocation2 + $0x208] sm:$0xf0]  ;;  %v1535_v51 = vld [vmem:[%s1818_s5 + $0x30] sm:$0xff]  ;;  %v1317_v56 = vld [vmem:[#allocation2 + $0x1e8] sm:$0xf]  ;;  %s1632_s14 = smov 108  }
  0x38   :  { %692 = vmatpush.bf16.msrb.mxu3 %v1230_v3  ;;  %730 = vmatpush.bf16.msra.mxu2 %v1246_v17  ;;  %v1114_v3 = vor.u32 %v1468_v2, %v1113_v1  ;;  %v1483_v17 = vld [vmem:[#allocation2 + $0xd0] sm:$0xf0]  ;;  %v1305_v60 = vld [vmem:[#allocation2 + $0x1d0] sm:$0xf]  ;;  %v1516_v61 = vld [vmem:[#allocation2 + $0x1d8] sm:$0xf0] }
  0x39   :  { %717 = vmatpush.bf16.msra.mxu1 %v1150_v34  ;;  %v1174_v19 = vor.u32 %v1483_v17, %v1173_v16  ;;  %v1353_v34 = vld [vmem:[#allocation2 + $0x230] sm:$0xf]  ;;  %v1519_v57 = vld [vmem:[#allocation2 + $0x1f0] sm:$0xf0]  ;;  %v1293_v63 = vld [vmem:[#allocation2 + $0x1b8] sm:$0xf]  ;;  %1000 = vrot.lane.b32.xlu0 %v1716_v15, %s1632_s14 }
  0x3a   :  { %v1354_v40 = vor.u32 %v1528_v35, %v1353_v34  ;;  %v1318_v59 = vor.u32 %v1519_v57, %v1317_v56  ;;  %v1281_v2 = vld [vmem:[#allocation2 + $0x1a0] sm:$0xf]  ;;  %v1269_v5 = vld [vmem:[#allocation2 + $0x188] sm:$0xf]  ;;  %v1532_v10 = vld [vmem:[%s1818_s5 + $0x18] sm:$0xff]  ;;  %s1633_s9 = smov 4  }
  0x3b   :  { %705 = vmatpush.bf16.msra.mxu0 %v1326_v29  ;;  %v1543_v11 = vld [vmem:[%s1818_s5 + $0x70] sm:$0xff]  ;;  %v1542_v12 = vld [vmem:[%s1818_s5 + $0x68] sm:$0xff]  ;;  %v1541_v14 = vld [vmem:[%s1818_s5 + $0x60] sm:$0xff]  ;;  %s1634_s0 = smov 124   ;;  %vm1017_vm2 = vcmask 31744   ;;  %s1030_s11 = sshll.u32 %s1820_s7, 4  ;;  %s1031_s11 = int_to_ptr.hbm [resolvable:$true] %s1030_s11 }
  0x3c   :  { %693 = vmatpush.bf16.msrb.mxu3 %v1218_v6  ;;  %731 = vmatpush.bf16.msra.mxu2 %v1234_v31  ;;  %v1185_v6 = vld [vmem:[#allocation2 + $0xe0] sm:$0xf]  ;;  %v1531_v15 = vld [vmem:[%s1818_s5 + $0x10] sm:$0xff]  ;;  %v1552_v17 = vld [vmem:[%s1818_s5 + $0xb8] sm:$0xff]  ;;  %vm1019_vm3 = vcmask 64512   ;;  %vm1021_vm4 = vcmask 97280  }
  0x3d   :  { %718 = vmatpush.bf16.msra.mxu1 %v1138_v46  ;;  %v1529_v16 = vld [vmem:[%s1818_s5] sm:$0xff]  ;;  %v1539_v20 = vld [vmem:[%s1818_s5 + $0x50] sm:$0xff]  ;;  %v1550_v21 = vld [vmem:[%s1818_s5 + $0xa8] sm:$0xff] }
  0x3e   :  { %v1538_v22 = vld [vmem:[%s1818_s5 + $0x48] sm:$0xff] }
  0x3f   :  { %706 = vmatpush.bf16.msra.mxu0 %v1314_v41 }
  0x40   :  { %694 = vmatpush.bf16.msrb.mxu3 %v1206_v9  ;;  %732 = vmatpush.bf16.msra.mxu2 %v1222_v43  ;;  %v1186_v9 = vor.u32 %v1486_v8, %v1185_v6  ;;  %v1507_v6 = vld [vmem:[#allocation2 + $0x190] sm:$0xf0]  ;;  %v1533_v8 = vld [vmem:[%s1818_s5 + $0x20] sm:$0xff] }
  0x41   :  { %719 = vmatpush.bf16.msra.mxu1 %v1126_v58  ;;  %v1534_v58 = vld [vmem:[%s1818_s5 + $0x28] sm:$0xff] }
  0x43   :  { %707 = vmatpush.bf16.msra.mxu0 %v1302_v53 }
  0x44   :  { %695 = vmatpush.bf16.msrb.mxu3 %v1194_v25  ;;  %733 = vmatpush.bf16.msra.mxu2 %v1210_v55  ;;  %v1077_v25 = vld [vmem:[#allocation2 + $0x8] sm:$0xf] }
  0x45   :  { %720 = vmatpush.bf16.msra.mxu1 %v1114_v3  ;;  %v1078_v28 = vor.u32 %v1459_v26, %v1077_v25  ;;  %v1510_v3 = vld [vmem:[#allocation2 + $0x1a8] sm:$0xf0]  ;;  %v1537_v25 = vld [vmem:[%s1818_s5 + $0x40] sm:$0xff] }
  0x46   :  { %v1282_v4 = vor.u32 %v1510_v3, %v1281_v2 }
  0x47   :  { %708 = vmatpush.bf16.msra.mxu0 %v1290_v62  ;;  %v1306_v62 = vor.u32 %v1516_v61, %v1305_v60 }
  0x48   :  { %696 = vmatpush.bf16.msrb.mxu3 %v1182_v37  ;;  %734 = vmatpush.bf16.msra.mxu2 %v1198_v0  ;;  %v1513_v0 = vld [vmem:[#allocation2 + $0x1c0] sm:$0xf0] }
  0x49   :  { %721 = vmatpush.bf16.msra.mxu1 %v1102_v13  ;;  %v1294_v1 = vor.u32 %v1513_v0, %v1293_v63  ;;  %v1530_v13 = vld [vmem:[%s1818_s5 + $0x8] sm:$0xff] }
  0x4b   :  { %709 = vmatpush.bf16.msra.mxu0 %v1278_v7  ;;  %v1270_v7 = vor.u32 %v1507_v6, %v1269_v5  ;;  %v1560_v6 = vld [vmem:[%s1819_s6] ss:$0 sm:$0xff]  ;;  %s1635_s6 = smov [#allocation5]  }
  0x4c   :  { %697 = vmatpush.bf16.msrb.mxu3 %v1170_v49  ;;  %735 = vmatpush.bf16.msra.mxu2 %v1186_v9  ;;  %v1329_v49 = vld [vmem:[#allocation2 + $0x200] sm:$0xf]  ;;  %v1544_v9 = vld [vmem:[%s1818_s5 + $0x78] sm:$0xff]  ;;  %s1028_s1 = sshll.u32 %s1635_s6, 4  ;;  %s1029_s1 = int_to_ptr.vmem [resolvable:$true] %s1028_s1 }
  0x4d   :  { %722 = vmatpush.bf16.msra.mxu1 %v1090_v23  ;;  %v1330_v55 = vor.u32 %v1522_v50, %v1329_v49  ;;  %v1549_v23 = vld [vmem:[%s1818_s5 + $0xa0] sm:$0xff] }
  0x4f   :  { %710 = vmatpush.bf16.msra.mxu0 %v1266_v18  ;;  %v1540_v18 = vld [vmem:[%s1818_s5 + $0x58] sm:$0xff] }
  0x50   :  { %736 = vmatpush.bf16.msra.mxu2 %v1174_v19  ;;  %v1551_v19 = vld [vmem:[%s1818_s5 + $0xb0] sm:$0xff] }
  0x51   :  { %723 = vmatpush.bf16.msra.mxu1 %v1078_v28 }
  0x8f   :  { %v114_v29 = vpop.f32.mrf.mxu0  ;;  %v127_v31 = vpop.f32.mrf.mxu1 }
  0x90   :  { %v115_v30 = vadd.f32 %v114_v29, %v56_v24  ;;  %v128_v32 = vadd.f32 %v127_v31, %v57_v27  ;;  %v246_v24 = vld [vmem:[%s1817_s4] sm:$0x7]  ;;  %v1548_v27 = vld [vmem:[%s1818_s5 + $0x98] sm:$0xff]  ;;  %v1547_v31 = vld [vmem:[%s1818_s5 + $0x90] sm:$0xff] }
  0x91   :  { %v248_v28 = vperm.slane %v246_v24, 0 }
  0x92   :  { %1561 = vtanh.f32 %v115_v30 }
  0x93   :  { %1563 = vtanh.f32 %v128_v32 }
  0x96   :  { %v140_v36 = vpop.f32.mrf.mxu2 }
  0x97   :  { %v141_v37 = vadd.f32 %v140_v36, %v58_v33  ;;  %v116_v38 = vpop.f32.mrf.mxu0  ;;  %v129_v41 = vpop.f32.mrf.mxu1  ;;  %v1546_v36 = vld [vmem:[%s1818_s5 + $0x88] sm:$0xff] }
  0x98   :  { %v1562_v39 = vpop.eup %1561 }
  0x99   :  { %v1564_v42 = vpop.eup %1563  ;;  %v147_v43 = vpack.c.bf16 %v1562_v39, %v1562_v39  ;;  %1565 = vtanh.f32 %v141_v37 }
  0x9a   :  { %v148_v46 = vpack.c.bf16 %v1564_v42, %v1564_v42  ;;  %v249_v42 = vperm.slane %v246_v24, 1 }
  0x9b   :  { %646 = vmatmul.bf16.vlgmr.msra.gmra.mxu3 %v147_v43  ;;  %685 = vmatmul.bf16.vlgmr.msrb.gmra.mxu2 %v147_v43 }
  0x9c   :  { %659 = vmatmul.bf16.vlgmr.msrb.gmra.mxu0 %v148_v46  ;;  %742 = vmatpush.bf16.msra.mxu3 %v1354_v40  ;;  %v1545_v40 = vld [vmem:[%s1818_s5 + $0x80] sm:$0xff] }
  0x9d   :  { %957 = vmatpush.bf16.msrb.mxu0 %v1536_v47  ;;  %983 = vmatpush.bf16.msrb.mxu2 %v1552_v17 }
  0x9e   :  { %v142_v52 = vpop.f32.mrf.mxu2 }
  0x9f   :  { %v1566_v53 = vpop.eup %1565 }
  0xa0   :  { %v149_v54 = vpack.c.bf16 %v1566_v53, %v1566_v53  ;;  %743 = vmatpush.bf16.msra.mxu3 %v1342_v48  ;;  %v250_v53 = vperm.slane %v246_v24, 2 }
  0xa1   :  { %958 = vmatpush.bf16.msrb.mxu0 %v1535_v51  ;;  %984 = vmatpush.bf16.msrb.mxu2 %v1551_v19 }
  0xa2   :  { %672 = vmatmul.bf16.vlgmr.msrb.gmra.mxu1 %v149_v54 }
  0xa3   :  { %970 = vmatpush.bf16.msrb.mxu1 %v1544_v9 }
  0xa4   :  { %744 = vmatpush.bf16.msra.mxu3 %v1330_v55 }
  0xa5   :  { %959 = vmatpush.bf16.msrb.mxu0 %v1534_v58  ;;  %985 = vmatpush.bf16.msrb.mxu2 %v1550_v21 }
  0xa7   :  { %971 = vmatpush.bf16.msrb.mxu1 %v1543_v11 }
  0xa8   :  { %745 = vmatpush.bf16.msra.mxu3 %v1318_v59 }
  0xa9   :  { %960 = vmatpush.bf16.msrb.mxu0 %v1533_v8  ;;  %986 = vmatpush.bf16.msrb.mxu2 %v1549_v23 }
  0xab   :  { %698 = vmatmul.bf16.vlgmr.msrb.gmra.mxu3 %v148_v46  ;;  %737 = vmatmul.bf16.vlgmr.msra.gmra.mxu2 %v148_v46 }
  0xac   :  { %711 = vmatmul.bf16.vlgmr.msra.gmra.mxu0 %v149_v54  ;;  %746 = vmatpush.bf16.msra.mxu3 %v1306_v62 }
  0xad   :  { %961 = vmatpush.bf16.msrb.mxu0 %v1532_v10  ;;  %972 = vmatpush.bf16.msrb.mxu1 %v1542_v12 }
  0xae   :  { %987 = vmatpush.bf16.msrb.mxu2 %v1548_v27 }
  0xb0   :  { %747 = vmatpush.bf16.msra.mxu3 %v1294_v1 }
  0xb1   :  { %962 = vmatpush.bf16.msrb.mxu0 %v1531_v15  ;;  %973 = vmatpush.bf16.msrb.mxu1 %v1541_v14 }
  0xb2   :  { %724 = vmatmul.bf16.vlgmr.msra.gmra.mxu1 %v147_v43  ;;  %988 = vmatpush.bf16.msrb.mxu2 %v1547_v31 }
  0xb4   :  { %748 = vmatpush.bf16.msra.mxu3 %v1282_v4 }
  0xb5   :  { %963 = vmatpush.bf16.msrb.mxu0 %v1530_v13  ;;  %974 = vmatpush.bf16.msrb.mxu1 %v1540_v18  ;;  %v1001_v13 = vpop.permute.xlu0 %1000 }
  0xb6   :  { %989 = vmatpush.bf16.msrb.mxu2 %v1546_v36 }
  0xb8   :  { %749 = vmatpush.bf16.msra.mxu3 %v1270_v7 }
  0xb9   :  { %964 = vmatpush.bf16.msrb.mxu0 %v1529_v16  ;;  %975 = vmatpush.bf16.msrb.mxu1 %v1539_v20 }
  0xba   :  { %990 = vmatpush.bf16.msrb.mxu2 %v1545_v40 }
  0xbb   :  { %750 = vmatmul.bf16.vlgmr.msra.gmra.mxu3 %v149_v54 }
  0xbd   :  { %976 = vmatpush.bf16.msrb.mxu1 %v1538_v22 }
  0xc1   :  { %977 = vmatpush.bf16.msrb.mxu1 %v1537_v25 }
 0x119   :  { %v660_v26 = vpop.f32.mrf.mxu0 }
 0x11e   :  { %v647_v29 = vpop.f32.mrf.mxu3  ;;  %v686_v30 = vpop.f32.mrf.mxu2 }
 0x11f   :  { %v648_v32 = vadd.f32 %v647_v29, %v248_v28  ;;  %v673_v33 = vpop.f32.mrf.mxu1  ;;  %v687_v46 = vadd.f32 %v686_v30, %v249_v42 }
 0x121   :  { %v661_v34 = vadd.f32 %v660_v26, %v648_v32  ;;  %v662_v35 = vpop.f32.mrf.mxu0 }
 0x123   :  { %v674_v37 = vadd.f32 %v673_v33, %v661_v34 }
 0x125   :  { %1567 = vtanh.f32 %v674_v37 }
 0x126   :  { %v649_v38 = vpop.f32.mrf.mxu3  ;;  %v688_v39 = vpop.f32.mrf.mxu2 }
 0x127   :  { %v675_v41 = vpop.f32.mrf.mxu1 }
 0x129   :  { %v712_v43 = vpop.f32.mrf.mxu0 }
 0x12b   :  { %v1568_v44 = vpop.eup %1567 }
 0x12c   :  { %v758_v45 = vpack.c.bf16 %v1568_v44, %v1568_v44 }
 0x12e   :  { %v699_v47 = vpop.f32.mrf.mxu3  ;;  %v738_v48 = vpop.f32.mrf.mxu2  ;;  %965 = vmatmul.bf16.vlgmr.msrb.gmra.mxu0 %v758_v45 }
 0x12f   :  { %v700_v49 = vadd.f32 %v699_v47, %v687_v46  ;;  %v725_v50 = vpop.f32.mrf.mxu1 }
 0x130   :  { %v726_v58 = vadd.f32 %v725_v50, %v250_v53 }
 0x131   :  { %v713_v51 = vadd.f32 %v712_v43, %v700_v49  ;;  %v714_v52 = vpop.f32.mrf.mxu0 }
 0x132   :  { %v739_v60 = vadd.f32 %v738_v48, %v726_v58 }
 0x133   :  { %1569 = vtanh.f32 %v713_v51 }
 0x136   :  { %v701_v54 = vpop.f32.mrf.mxu3  ;;  %v740_v55 = vpop.f32.mrf.mxu2 }
 0x137   :  { %v727_v56 = vpop.f32.mrf.mxu1 }
 0x139   :  { %v1570_v57 = vpop.eup %1569 }
 0x13a   :  { %v759_v59 = vpack.c.bf16 %v1570_v57, %v1570_v57 }
 0x13c   :  { %978 = vmatmul.bf16.vlgmr.msrb.gmra.mxu1 %v759_v59 }
 0x13e   :  { %v751_v61 = vpop.f32.mrf.mxu3 }
 0x13f   :  { %v752_v62 = vadd.f32 %v751_v61, %v739_v60 }
 0x141   :  { %1571 = vtanh.f32 %v752_v62 }
 0x146   :  { %v753_v63 = vpop.f32.mrf.mxu3 }
 0x147   :  { %v1572_v0 = vpop.eup %1571 }
 0x148   :  { %v760_v1 = vpack.c.bf16 %v1572_v0, %v1572_v0 }
 0x14a   :  { %991 = vmatmul.bf16.vlgmr.msrb.gmra.mxu2 %v760_v1 }
 0x1ab   :  { %v966_v2 = vpop.f32.mrf.mxu0 }
 0x1ac   :  { %v967_v7 = vadd.f32 %v1560_v6, %v966_v2 }
 0x1b3   :  { %v968_v3 = vpop.f32.mrf.mxu0 }
 0x1b9   :  { %v979_v4 = vpop.f32.mrf.mxu1 }
 0x1ba   :  { %v980_v8 = vadd.f32 %v979_v4, %v967_v7 }
 0x1c1   :  { %v981_v5 = vpop.f32.mrf.mxu1 }
 0x1cd   :  { %v992_v9 = vpop.f32.mrf.mxu2 }
 0x1ce   :  { %v993_v10 = vadd.f32 %v992_v9, %v980_v8 }
 0x1d0   :  { %1573 = vtanh.f32 %v993_v10 }
 0x1d5   :  { %v994_v11 = vpop.f32.mrf.mxu2 }
 0x1d6   :  { %v1574_v15 = vpop.eup %1573 }
 0x1d7   :  { %1010 = vrot.lane.b32.xlu1 %v1574_v15, %s1633_s9  ;;  %v997_v12 = vmul.f32 1.442695, %v1574_v15 }
 0x1d9   :  { %1575 = vpow2.f32 %v997_v12 }
 0x1df   :  { %v1576_v14 = vpop.eup %1575 }
 0x1e0   :  { %v1003_v16 = vmul.f32 %v1576_v14, %v1001_v13  ;;  %1014 = vrot.lane.b32.xlu1 %v1576_v14, %s1633_s9 }
 0x1e2   :  { %1005 = vrot.lane.b32.xlu0 %v1003_v16, %s1634_s0 }
 0x249   :  { %v1011_v17 = vpop.permute.xlu1 %1010 }
 0x252   :  { %v1015_v20 = vpop.permute.xlu1 %1014 }
 0x254   :  { %v1006_v18 = vpop.permute.xlu0 %1005 }
 0x255   :  { %v1008_v19 = vadd.f32 %v1574_v15, %v1006_v18 }
 0x257   :  { %v1018_v21 = vsel %vm1017_vm2, %v1008_v19, %v1011_v17 }
 0x258   :  { %v1020_v22 = vsel %vm1019_vm3, %v1018_v21, %v1015_v20 }
 0x259   :  { %1022 = vst.msk [vmem:[#allocation5] sm:$0xff] %vm1021_vm4, %v1020_v22 }
 0x25a   :  { %1033 = dma.vmem_to_hbm [thread:$0]  %s1029_s1, 128, %s1031_s11, [#allocation4]  }
 0x25b   :  { %1627 = dma.done.wait [#allocation4], 128  }
 0x25c   :  { %1628 = vsyncadd [#allocation4], 4294967168 }
 0x25d   :  { %1038 = vsyncpa [#allocation3], 1 }
 0x25e   :  { %1039 = vsyncpa [#allocation4], 1 }

</bundles_post_ra>
